<compile_context>
chip_gen: v7x
topology: tpu7x:2x2x1
jax: 0.10.0
libtpu: 0.0.40
codegen_flags: <defaults>
</compile_context>

<pallas_src>
from math import sqrt

import jax
import jax.numpy as jnp
from jax.experimental import pallas as pl
from jax.experimental.pallas import tpu as pltpu


def _round_up(n, m):
    return ((n + m - 1) // m) * m


def mlp_softmax_kernel(x_ref, w1_ref, b1_ref, w2_ref, b2_ref, w3_ref, b3_ref, o_ref):
    # x arrives un-padded f32; cast to bf16 right before the MXU. Accumulate in f32.
    x = x_ref[...].astype(jnp.bfloat16)

    # Linear(16 -> H) + ReLU   (Dropout is identity at inference)
    h1 = jnp.dot(x, w1_ref[...], preferred_element_type=jnp.float32) + b1_ref[...]
    h1 = jnp.maximum(h1, 0.0).astype(jnp.bfloat16)   # single cast point, bf16 intermediate

    # Linear(H -> H) + ReLU
    h2 = jnp.dot(h1, w2_ref[...], preferred_element_type=jnp.float32) + b2_ref[...]
    h2 = jnp.maximum(h2, 0.0).astype(jnp.bfloat16)

    # Linear(H -> 9): w3 is lane-padded to 128 columns, padded bias entries are -1e30
    # so exp(padded) == 0 and the softmax denominator only sees the 9 real classes.
    logits = jnp.dot(h2, w3_ref[...], preferred_element_type=jnp.float32) + b3_ref[...]

    # Numerically stable softmax in f32; reciprocal on the EUP slot (free).
    m = jnp.max(logits, axis=-1, keepdims=True)
    e = jnp.exp(logits - m)
    denom = jnp.sum(e, axis=-1, keepdims=True)
    probs = e * pl.reciprocal(denom, approx=True)

    # Store only the real classes (narrow last block dim == full output array dim).
    o_ref[...] = probs[:, : o_ref.shape[-1]]


def prepare_params(w1, b1, w2, b2, w3, b3):
    """Pad / cast the weights once (hoisted out of the per-call hot path).

    Weights are stored (in_features, out_features) so y = x @ W + b, matching
    PyTorch Linear (which stores (out, in) and applies x @ W.T + b).
    """
    n_in, n_hidden = w1.shape
    n_out = w3.shape[1]
    h_p = _round_up(n_hidden, 128)
    out_p = _round_up(n_out, 128)

    w1p = jnp.pad(w1, ((0, 0), (0, h_p - n_hidden))).astype(jnp.bfloat16)
    b1p = jnp.pad(b1.reshape(1, -1), ((0, 0), (0, h_p - n_hidden))).astype(jnp.float32)
    w2p = jnp.pad(w2, ((0, h_p - n_hidden), (0, h_p - n_hidden))).astype(jnp.bfloat16)
    b2p = jnp.pad(b2.reshape(1, -1), ((0, 0), (0, h_p - n_hidden))).astype(jnp.float32)
    w3p = jnp.pad(w3, ((0, h_p - n_hidden), (0, out_p - n_out))).astype(jnp.bfloat16)
    # Bake the class mask into the bias: padded w3 columns are zero, so logits at the
    # padded columns are exactly -1e30 -> exp underflows to 0 in the softmax.
    b3p = jnp.pad(b3.reshape(1, -1), ((0, 0), (0, out_p - n_out)),
                  constant_values=-1e30).astype(jnp.float32)
    return (w1p, b1p, w2p, b2p, w3p, b3p), n_out


def nn_forward(x, params, n_out, *, batch_tile=2048):
    """x: (B, 16) f32. params: output of prepare_params."""
    w1p, b1p, w2p, b2p, w3p, b3p = params
    B, n_in = x.shape
    h_p = w1p.shape[1]
    out_p = w3p.shape[1]

    if B >= 2 * batch_tile:
        # Large batch: tile the batch axis. "parallel" lets v7x shard the grid across
        # both TensorCores; BlockSpec double-buffers the x / out DMAs while the tiny
        # weights stay VMEM-resident via constant index_maps.
        tb = batch_tile
        b_pad = _round_up(B, tb)
        xp = jnp.pad(x, ((0, b_pad - B), (0, 0))) if b_pad != B else x

        def const(shape):
            return pl.BlockSpec(shape, lambda i: (0, 0))

        out = pl.pallas_call(
            mlp_softmax_kernel,
            out_shape=jax.ShapeDtypeStruct((b_pad, n_out), jnp.float32),
            grid=(b_pad // tb,),
            in_specs=[
                pl.BlockSpec((tb, n_in), lambda i: (i, 0)),   # last dim == full dim
                const((n_in, h_p)), const((1, h_p)),
                const((h_p, h_p)), const((1, h_p)),
                const((h_p, out_p)), const((1, out_p)),
            ],
            out_specs=pl.BlockSpec((tb, n_out), lambda i: (i, 0)),  # narrow, un-padded
            compiler_params=pltpu.CompilerParams(
                dimension_semantics=("parallel",),
                vmem_limit_bytes=32 << 20),
        )(xp, w1p, b1p, w2p, b2p, w3p, b3p)
        if b_pad != B:
            out = out[:B]       # batch-axis slice only when padding was needed
        return out

    # Small batch (~KBs of data): no grid, everything VMEM-resident, output emitted
    # directly at (B, n_out) so the forward is a single pallas_call with no post-op.
    vmem = pl.BlockSpec(memory_space=pltpu.MemorySpace.VMEM)
    return pl.pallas_call(
        mlp_softmax_kernel,
        out_shape=jax.ShapeDtypeStruct((B, n_out), jnp.float32),
        in_specs=[vmem] * 7,
        out_specs=vmem,
    )(x, w1p, b1p, w2p, b2p, w3p, b3p)


def nn_reference(x, w1, b1, w2, b2, w3, b3):
    h1 = jnp.maximum(x @ w1 + b1, 0.0)
    h2 = jnp.maximum(h1 @ w2 + b2, 0.0)
    logits = h2 @ w3 + b3
    return jax.nn.softmax(logits, axis=-1)


def init_linear(key, fan_in, fan_out):
    # PyTorch default Linear init: U(-1/sqrt(fan_in), 1/sqrt(fan_in))
    kw, kb = jax.random.split(key)
    bound = 1.0 / sqrt(fan_in)
    w = jax.random.uniform(kw, (fan_in, fan_out), jnp.float32, -bound, bound)
    b = jax.random.uniform(kb, (1, fan_out), jnp.float32, -bound, bound)
    return w, b


if __name__ == "__main__":
    # TODO(synk): Dropout is a no-op in inference; training-mode dropout masks are not implemented.
    B = 8     # batch
    IN = 16   # input features (fixed by the module)
    H = 32    # hidden_layer_width
    OUT = 9   # output classes (fixed by the module)

    key = jax.random.PRNGKey(0)
    kx, k1, k2, k3 = jax.random.split(key, 4)

    x = jax.random.normal(kx, (B, IN), jnp.float32)
    w1, b1 = init_linear(k1, IN, H)
    w2, b2 = init_linear(k2, H, H)
    w3, b3 = init_linear(k3, H, OUT)

    # Pad / cast weights once (hoisted out of the per-call path).
    params, n_out = prepare_params(w1, b1, w2, b2, w3, b3)

    # Small-batch (no-grid, VMEM-resident) path.
    out = jax.block_until_ready(nn_forward(x, params, n_out))
    ref = nn_reference(x, w1, b1, w2, b2, w3, b3)
    assert out.shape == (B, OUT)
    assert bool(jnp.allclose(jnp.sum(out, axis=-1), 1.0, atol=5e-3))
    assert bool(jnp.allclose(out, ref, atol=3e-2))

    # Exercise the batch-tiled "parallel" grid path at a modest size.
    B2 = 128
    x2 = jax.random.normal(jax.random.PRNGKey(1), (B2, IN), jnp.float32)
    out2 = jax.block_until_ready(nn_forward(x2, params, n_out, batch_tile=64))
    ref2 = nn_reference(x2, w1, b1, w2, b2, w3, b3)
    assert out2.shape == (B2, OUT)
    assert bool(jnp.allclose(jnp.sum(out2, axis=-1), 1.0, atol=5e-3))
    assert bool(jnp.allclose(out2, ref2, atol=3e-2))

    print("KERNEL_OK")
</pallas_src>

<mosaic_0001>
module attributes {stable_mosaic.version = 11 : i64} {
  func.func @mlp_softmax_kernel(%arg0: memref<8x16xf32, #tpu.memory_space<vmem>>, %arg1: memref<16x128xbf16, #tpu.memory_space<vmem>>, %arg2: memref<1x128xf32, #tpu.memory_space<vmem>>, %arg3: memref<128x128xbf16, #tpu.memory_space<vmem>>, %arg4: memref<1x128xf32, #tpu.memory_space<vmem>>, %arg5: memref<128x128xbf16, #tpu.memory_space<vmem>>, %arg6: memref<1x128xf32, #tpu.memory_space<vmem>>, %arg7: memref<8x9xf32, #tpu.memory_space<vmem>>) attributes {dimension_semantics = [], scalar_prefetch = 0 : i64, scratch_operands = 0 : i64, tpu.core_type = #tpu.core_type<tc>} {
    %c0 = arith.constant 0 : index
    %c0_0 = arith.constant 0 : index
    %0 = vector.load %arg0[%c0, %c0_0] : memref<8x16xf32, #tpu.memory_space<vmem>>, vector<8x16xf32>
    %1 = arith.truncf %0 : vector<8x16xf32> to vector<8x16xbf16>
    %c0_1 = arith.constant 0 : index
    %c0_2 = arith.constant 0 : index
    %2 = vector.load %arg1[%c0_1, %c0_2] : memref<16x128xbf16, #tpu.memory_space<vmem>>, vector<16x128xbf16>
    %cst = arith.constant dense<0.000000e+00> : vector<8x128xf32>
    %3 = tpu.matmul %1, %2, %cst {dimension_numbers = #tpu.dot_dimension_numbers<[1], [0], [0], [1], [0, 0, 1, 1], [], []>} : vector<8x16xbf16>, vector<16x128xbf16>, vector<8x128xf32> -> vector<8x128xf32>
    %c0_3 = arith.constant 0 : index
    %c0_4 = arith.constant 0 : index
    %4 = vector.load %arg2[%c0_3, %c0_4] : memref<1x128xf32, #tpu.memory_space<vmem>>, vector<1x128xf32>
    %5 = vector.broadcast %4 : vector<1x128xf32> to vector<8x128xf32>
    %6 = arith.addf %3, %5 : vector<8x128xf32>
    %cst_5 = arith.constant 0.000000e+00 : f32
    %7 = vector.broadcast %cst_5 : f32 to vector<8x128xf32>
    %8 = arith.maximumf %6, %7 : vector<8x128xf32>
    %9 = arith.truncf %8 : vector<8x128xf32> to vector<8x128xbf16>
    %c0_6 = arith.constant 0 : index
    %c0_7 = arith.constant 0 : index
    %10 = vector.load %arg3[%c0_6, %c0_7] : memref<128x128xbf16, #tpu.memory_space<vmem>>, vector<128x128xbf16>
    %cst_8 = arith.constant dense<0.000000e+00> : vector<8x128xf32>
    %11 = tpu.matmul %9, %10, %cst_8 {dimension_numbers = #tpu.dot_dimension_numbers<[1], [0], [0], [1], [0, 0, 1, 1], [], []>} : vector<8x128xbf16>, vector<128x128xbf16>, vector<8x128xf32> -> vector<8x128xf32>
    %c0_9 = arith.constant 0 : index
    %c0_10 = arith.constant 0 : index
    %12 = vector.load %arg4[%c0_9, %c0_10] : memref<1x128xf32, #tpu.memory_space<vmem>>, vector<1x128xf32>
    %13 = vector.broadcast %12 : vector<1x128xf32> to vector<8x128xf32>
    %14 = arith.addf %11, %13 : vector<8x128xf32>
    %cst_11 = arith.constant 0.000000e+00 : f32
    %15 = vector.broadcast %cst_11 : f32 to vector<8x128xf32>
    %16 = arith.maximumf %14, %15 : vector<8x128xf32>
    %17 = arith.truncf %16 : vector<8x128xf32> to vector<8x128xbf16>
    %c0_12 = arith.constant 0 : index
    %c0_13 = arith.constant 0 : index
    %18 = vector.load %arg5[%c0_12, %c0_13] : memref<128x128xbf16, #tpu.memory_space<vmem>>, vector<128x128xbf16>
    %cst_14 = arith.constant dense<0.000000e+00> : vector<8x128xf32>
    %19 = tpu.matmul %17, %18, %cst_14 {dimension_numbers = #tpu.dot_dimension_numbers<[1], [0], [0], [1], [0, 0, 1, 1], [], []>} : vector<8x128xbf16>, vector<128x128xbf16>, vector<8x128xf32> -> vector<8x128xf32>
    %c0_15 = arith.constant 0 : index
    %c0_16 = arith.constant 0 : index
    %20 = vector.load %arg6[%c0_15, %c0_16] : memref<1x128xf32, #tpu.memory_space<vmem>>, vector<1x128xf32>
    %21 = vector.broadcast %20 : vector<1x128xf32> to vector<8x128xf32>
    %22 = arith.addf %19, %21 : vector<8x128xf32>
    %cst_17 = arith.constant dense<0xFF800000> : vector<8xf32>
    %23 = vector.multi_reduction <maximumf>, %22, %cst_17 [1] : vector<8x128xf32> to vector<8xf32>
    %24 = vector.shape_cast %23 : vector<8xf32> to vector<8x1xf32>
    %25 = vector.broadcast %24 : vector<8x1xf32> to vector<8x128xf32>
    %26 = arith.subf %22, %25 : vector<8x128xf32>
    %27 = math.exp %26 : vector<8x128xf32>
    %cst_18 = arith.constant dense<0.000000e+00> : vector<8xf32>
    %28 = vector.multi_reduction <add>, %27, %cst_18 [1] : vector<8x128xf32> to vector<8xf32>
    %29 = vector.shape_cast %28 : vector<8xf32> to vector<8x1xf32>
    %30 = tpu.reciprocal %29 {approx = true} : vector<8x1xf32> -> vector<8x1xf32>
    %31 = vector.broadcast %30 : vector<8x1xf32> to vector<8x128xf32>
    %32 = arith.mulf %27, %31 : vector<8x128xf32>
    %33 = vector.extract_strided_slice %32 {offsets = [0, 0], sizes = [8, 9], strides = [1, 1]} : vector<8x128xf32> to vector<8x9xf32>
    %c0_19 = arith.constant 0 : index
    %c0_20 = arith.constant 0 : index
    %34 = vector.load %arg7[%c0_19, %c0_20] : memref<8x9xf32, #tpu.memory_space<vmem>>, vector<8x9xf32>
    tpu.vector_store %arg7[%c0_19, %c0_20], %33 {strides = array<i32>} : memref<8x9xf32, #tpu.memory_space<vmem>>, vector<8x9xf32>,
    return
  }
}

</mosaic_0001>

<bundles_post_ra>
// kernel: tpu_custom_call.1
= control target key start
LH: loop header
LB: loop body
LE: loop exit
PB: predicated region body
PF: predicated region fallthrough
CT: control target
= control target key end

     0   :  { %12 = vsyncpa [#allocation3], 0  ;;  %s778_s0 = inlined_call_operand.hbm [shape: f32[8,16], index: 0, kind: input, shape index: {}]   ;;  %s779_s1 = inlined_call_operand.hbm [shape: bf16[16,128], index: 1, kind: input, shape index: {}]   ;;  %s780_s2 = inlined_call_operand.vmem [shape: f32[1,128], index: 2, kind: input, shape index: {}]   ;;  %s781_s3 = inlined_call_operand.hbm [shape: bf16[128,128], index: 3, kind: input, shape index: {}]   ;;  %s782_s4 = inlined_call_operand.vmem [shape: f32[1,128], index: 4, kind: input, shape index: {}]   ;;  %s783_s5 = inlined_call_operand.hbm [shape: bf16[128,128], index: 5, kind: input, shape index: {}]   ;;  %s784_s6 = inlined_call_operand.vmem [shape: f32[1,128], index: 6, kind: input, shape index: {}]   ;;  %s785_s7 = inlined_call_operand.hbm [shape: f32[8,9], index: 7, kind: output, shape index: {}]  }
   0x1   :  { %13 = vsyncpa [#allocation6], 0 }
   0x2   :  { %14 = vsyncpa [#allocation9], 0 }
   0x3   :  { %15 = vsyncpa [#allocation4], 0  ;;  %s631_s24 = smov [#allocation5]   ;;  %s513_s28 = scalar_lea.hbm %s779_s1, 128 }
   0x4   :  { %s31_s25 = sshll.u32 %s631_s24, 4  ;;  %p514_p0 = scmp.ne.s32.totalorder %s779_s1, %s513_s28  ;;  %s32_s25 = int_to_ptr.vmem [resolvable:$true] %s31_s25 }
   0x5   :  { %p517_p1 = scmp.lt.u32.totalorder %s513_s28, %s779_s1 }
   0x7   :  { %p519_p2 = pnand %p517_p1, %p514_p0 }
   0x9   :  { %522 = shalt.err (!%p519_p2)
}
   0xa   :  { %s523_s10 = scalar_lea.vmem %s32_s25, 128  ;;  %p528_p4 = scmp.lt.s32.totalorder %s32_s25, %s32_s25 }
   0xb   :  { %p524_p3 = scmp.ne.s32.totalorder %s32_s25, %s523_s10  ;;  %p529_p5 = scmp.lt.s32.totalorder %s523_s10, %s523_s10 }
   0xd   :  { %p530_p6 = por %p529_p5, %p528_p4 }
   0xf   :  { %p531_p7 = pnand %p530_p6, %p524_p3 }
  0x11   :  { %534 = shalt.err (!%p531_p7)
}
  0x12   :  { %s632_s11 = smov 64   ;;  %s633_s12 = smov 4  }
  0x13   :  { %37 = dma.hbm_to_vmem [thread:$0]  %s779_s1, 128, %s32_s25, [#allocation6], %s632_s11, %s632_s11, %s633_s12  }
  0x14   :  { %s634_s15 = smov [#allocation2]   ;;  %s635_s17 = smov [#allocation7]  }
  0x15   :  { %s22_s16 = sshll.u32 %s634_s15, 4  ;;  %s45_s18 = sshll.u32 %s635_s17, 4  ;;  %s23_s16 = int_to_ptr.vmem [resolvable:$true] %s22_s16  ;;  %s46_s18 = int_to_ptr.vmem [resolvable:$true] %s45_s18 }
  0x16   :  { %s535_s21 = scalar_lea.hbm %s778_s0, 128 }
  0x17   :  { %p536_p8 = scmp.ne.s32.totalorder %s778_s0, %s535_s21  ;;  %p539_p9 = scmp.lt.u32.totalorder %s535_s21, %s778_s0 }
  0x19   :  { %p541_p10 = pnand %p539_p9, %p536_p8 }
  0x1b   :  { %544 = shalt.err (!%p541_p10)
}
  0x1c   :  { %s545_s1 = scalar_lea.vmem %s23_s16, 128  ;;  %p550_p12 = scmp.lt.s32.totalorder %s23_s16, %s23_s16 }
  0x1d   :  { %p546_p11 = scmp.ne.s32.totalorder %s23_s16, %s545_s1  ;;  %p551_p13 = scmp.lt.s32.totalorder %s545_s1, %s545_s1 }
  0x1f   :  { %p552_p0 = por %p551_p13, %p550_p12 }
  0x21   :  { %p553_p1 = pnand %p552_p0, %p546_p11 }
  0x23   :  { %556 = shalt.err (!%p553_p1)
}
  0x24   :  { %25 = dma.hbm_to_vmem [thread:$0]  %s778_s0, 128, %s23_s16, [#allocation3]  }
  0x25   :  { %s557_s30 = scalar_lea.hbm %s781_s3, 1024 }
  0x26   :  { %p558_p2 = scmp.ne.s32.totalorder %s781_s3, %s557_s30  ;;  %p561_p3 = scmp.lt.u32.totalorder %s557_s30, %s781_s3 }
  0x28   :  { %p563_p4 = pnand %p561_p3, %p558_p2 }
  0x2a   :  { %566 = shalt.err (!%p563_p4)
}
  0x2b   :  { %s567_s14 = scalar_lea.vmem %s46_s18, 1024  ;;  %p572_p6 = scmp.lt.s32.totalorder %s46_s18, %s46_s18 }
  0x2c   :  { %p568_p5 = scmp.ne.s32.totalorder %s46_s18, %s567_s14  ;;  %p573_p7 = scmp.lt.s32.totalorder %s567_s14, %s567_s14 }
  0x2e   :  { %p574_p8 = por %p573_p7, %p572_p6 }
  0x30   :  { %p575_p9 = pnand %p574_p8, %p568_p5 }
  0x32   :  { %578 = shalt.err (!%p575_p9)
}
  0x33   :  { %51 = dma.hbm_to_vmem [thread:$0]  %s781_s3, 1024, %s46_s18, [#allocation6], %s632_s11, %s632_s11, %s633_s12  }
  0x34   :  { %s636_s16 = smov [#allocation8]   ;;  %s579_s21 = scalar_lea.hbm %s783_s5, 1024 }
  0x35   :  { %s59_s17 = sshll.u32 %s636_s16, 4  ;;  %p580_p10 = scmp.ne.s32.totalorder %s783_s5, %s579_s21  ;;  %s60_s17 = int_to_ptr.vmem [resolvable:$true] %s59_s17 }
  0x36   :  { %p583_p11 = scmp.lt.u32.totalorder %s579_s21, %s783_s5 }
  0x38   :  { %p585_p12 = pnand %p583_p11, %p580_p10 }
  0x3a   :  { %588 = shalt.err (!%p585_p12)
}
  0x3b   :  { %s589_s1 = scalar_lea.vmem %s60_s17, 1024  ;;  %p594_p0 = scmp.lt.s32.totalorder %s60_s17, %s60_s17 }
  0x3c   :  { %p590_p13 = scmp.ne.s32.totalorder %s60_s17, %s589_s1  ;;  %p595_p1 = scmp.lt.s32.totalorder %s589_s1, %s589_s1 }
  0x3e   :  { %p596_p2 = por %p595_p1, %p594_p0 }
  0x40   :  { %p597_p3 = pnand %p596_p2, %p590_p13 }
  0x42   :  { %600 = shalt.err (!%p597_p3)
}
  0x43   :  { %65 = dma.hbm_to_vmem [thread:$0]  %s783_s5, 1024, %s60_s17, [#allocation9], %s632_s11, %s632_s11, %s633_s12  }
  0x44   :  { %623 = dma.done.wait [#allocation3], 128  }
  0x45   :  { %624 = vsyncadd [#allocation3], 4294967168 }
  0x46   :  { %625 = dma.done.wait [#allocation6], 1152  }
  0x47   :  { %626 = vsyncadd [#allocation6], 4294966144 }
  0x48   :  { %627 = dma.done.wait [#allocation9], 1024  }
  0x49   :  { %628 = vsyncadd [#allocation9], 4294966272  ;;  %v637_v0 = vmov 0.0   ;;  %vm638_vm0 = vmmov 0   ;;  %v492_v1 = vld [vmem:[#allocation5] sm:$0xff]   ;;  %v81_v2 = vld [vmem:[#allocation2] sm:$0xff] }
  0x4a   :  { %437 = vmatprep.subr.bf16.mxu0 %v637_v0  ;;  %439 = vmatprep.mubr.msk.bf16.mxu0 %vm638_vm0, %v637_v0  ;;  %v82_v3 = vpack.c.bf16 %v81_v2, %v81_v2  ;;  %vm98_vm1 = vcmask 130048   ;;  %v493_v4 = vld [vmem:[#allocation7] sm:$0xff]   ;;  %v494_v5 = vld [vmem:[#allocation7 + $0x8] sm:$0xff]   ;;  %v495_v6 = vld [vmem:[#allocation7 + $0x10] sm:$0xff]   ;;  %vm377_vm2 = vcmask 72704  }
  0x4b   :  { %443 = vmatprep.subr.bf16.mxu1 %v637_v0  ;;  %459 = vmatprep.mubr.msk.bf16.mxu1 %vm638_vm0, %v637_v0  ;;  %v496_v7 = vld [vmem:[#allocation7 + $0x18] sm:$0xff]   ;;  %v497_v8 = vld [vmem:[#allocation7 + $0x20] sm:$0xff]   ;;  %v498_v9 = vld [vmem:[#allocation7 + $0x28] sm:$0xff]  }
  0x4c   :  { %438 = vmatpush3.bf16.msra.mxu0 %v492_v1  ;;  %444 = vmatpush3.bf16.msra.mxu1 %v493_v4  ;;  %v499_v10 = vld [vmem:[#allocation7 + $0x30] sm:$0xff]   ;;  %v500_v11 = vld [vmem:[#allocation7 + $0x38] sm:$0xff]   ;;  %v501_v12 = vld [vmem:[#allocation8] sm:$0xff]  }
  0x4d   :  { %463 = vmatprep.subr.bf16.mxu0 %v637_v0  ;;  %445 = vmatprep.subr.bf16.mxu1 %v637_v0  ;;  %v502_v13 = vld [vmem:[#allocation8 + $0x8] sm:$0xff]   ;;  %v503_v14 = vld [vmem:[#allocation8 + $0x10] sm:$0xff]   ;;  %v504_v15 = vld [vmem:[#allocation8 + $0x18] sm:$0xff]  }
  0x4e   :  { %v505_v16 = vld [vmem:[#allocation8 + $0x20] sm:$0xff]   ;;  %v506_v17 = vld [vmem:[#allocation8 + $0x28] sm:$0xff]   ;;  %v396_v18 = vld [vmem:[%s780_s2] ss:$0 sm:$0xff] }
  0x4f   :  { %440 = vmatmul.mubr.msk.bf16.vlgmr.msra.gmra.mrb[0].mxu0 %vm98_vm1, %v82_v3  ;;  %v507_v26 = vld [vmem:[#allocation8 + $0x30] sm:$0xff]   ;;  %v508_v27 = vld [vmem:[#allocation8 + $0x38] sm:$0xff]  }
  0x50   :  { %479 = vmatprep.mubr.msk.bf16.mxu0 %vm638_vm0, %v637_v0  ;;  %446 = vmatpush3.bf16.msra.mxu1 %v494_v5  ;;  %v399_v28 = vld [vmem:[%s782_s4] ss:$0 sm:$0xff]  ;;  %s639_s4 = smov [#allocation10]  }
  0x51   :  { %447 = vmatprep.subr.bf16.mxu1 %v637_v0  ;;  %464 = vmatpush3.bf16.msra.mxu0 %v501_v12  ;;  %v408_v36 = vld [vmem:[%s784_s6] ss:$0 sm:$0xff]  ;;  %s385_s28 = sshll.u32 %s639_s4, 4  ;;  %s386_s28 = int_to_ptr.vmem [resolvable:$true] %s385_s28 }
  0x52   :  { %465 = vmatprep.subr.bf16.mxu0 %v637_v0  ;;  %s601_s6 = scalar_lea.vmem %s386_s28, 128  ;;  %p606_p5 = scmp.lt.s32.totalorder %s386_s28, %s386_s28 }
  0x53   :  { %p602_p4 = scmp.ne.s32.totalorder %s386_s28, %s601_s6  ;;  %p607_p6 = scmp.lt.s32.totalorder %s601_s6, %s601_s6 }
  0x54   :  { %448 = vmatpush3.bf16.msra.mxu1 %v495_v6 }
  0x55   :  { %449 = vmatprep.subr.bf16.mxu1 %v637_v0  ;;  %466 = vmatpush3.bf16.msra.mxu0 %v502_v13  ;;  %p608_p7 = por %p607_p6, %p606_p5 }
  0x56   :  { %467 = vmatprep.subr.bf16.mxu0 %v637_v0 }
  0x57   :  { %p609_p8 = pnand %p608_p7, %p602_p4 }
  0x58   :  { %450 = vmatpush3.bf16.msra.mxu1 %v496_v7 }
  0x59   :  { %451 = vmatprep.subr.bf16.mxu1 %v637_v0  ;;  %468 = vmatpush3.bf16.msra.mxu0 %v503_v14 }
  0x5a   :  { %469 = vmatprep.subr.bf16.mxu0 %v637_v0 }
  0x5c   :  { %452 = vmatpush3.bf16.msra.mxu1 %v497_v8 }
  0x5d   :  { %453 = vmatprep.subr.bf16.mxu1 %v637_v0  ;;  %470 = vmatpush3.bf16.msra.mxu0 %v504_v15 }
  0x5e   :  { %471 = vmatprep.subr.bf16.mxu0 %v637_v0 }
  0x60   :  { %454 = vmatpush3.bf16.msra.mxu1 %v498_v9 }
  0x61   :  { %455 = vmatprep.subr.bf16.mxu1 %v637_v0  ;;  %472 = vmatpush3.bf16.msra.mxu0 %v505_v16 }
  0x62   :  { %473 = vmatprep.subr.bf16.mxu0 %v637_v0 }
  0x64   :  { %456 = vmatpush3.bf16.msra.mxu1 %v499_v10 }
  0x65   :  { %457 = vmatprep.subr.bf16.mxu1 %v637_v0  ;;  %474 = vmatpush3.bf16.msra.mxu0 %v506_v17 }
  0x66   :  { %475 = vmatprep.subr.bf16.mxu0 %v637_v0 }
  0x68   :  { %458 = vmatpush3.bf16.msra.mxu1 %v500_v11 }
  0x69   :  { %476 = vmatpush3.bf16.msra.mxu0 %v507_v26 }
  0x6a   :  { %477 = vmatprep.subr.bf16.mxu0 %v637_v0 }
  0x6d   :  { %478 = vmatpush3.bf16.msra.mxu0 %v508_v27 }
 0x122   :  { %v136_v19 = vpop.f32.mrb[0].mxu0 }
 0x123   :  { %v137_v20 = vadd.f32 %v396_v18, %v136_v19  ;;  %v441_v21 = vpop.f32.mrb[1].mxu0 }
 0x124   :  { %v139_v22 = vpop.f32.mrb[2].mxu0 }
 0x125   :  { %v142_v23 = vmax.f32 %v137_v20, 0.0  ;;  %v442_v24 = vpop.f32.mrb[3].mxu0 }
 0x127   :  { %v143_v25 = vpack.c.bf16 %v142_v23, %v142_v23 }
 0x129   :  { %460 = vmatmul.mubr.bf16.vlgmr.msra.gmra.mrb[0].mxu1 %v143_v25 }
 0x1fc   :  { %v249_v29 = vpop.f32.mrb[0].mxu1 }
 0x1fd   :  { %v250_v30 = vadd.f32 %v399_v28, %v249_v29  ;;  %v461_v31 = vpop.f32.mrb[1].mxu1 }
 0x1fe   :  { %v252_v32 = vpop.f32.mrb[2].mxu1 }
 0x1ff   :  { %v255_v33 = vmax.f32 %v250_v30, 0.0  ;;  %v462_v34 = vpop.f32.mrb[3].mxu1 }
 0x201   :  { %v256_v35 = vpack.c.bf16 %v255_v33, %v255_v33 }
 0x203   :  { %480 = vmatmul.mubr.bf16.vlgmr.msra.gmra.mrb[4].mxu0 %v256_v35 }
 0x2d6   :  { %v362_v37 = vpop.f32.mrb[4].mxu0 }
 0x2d7   :  { %v363_v38 = vadd.f32 %v408_v36, %v362_v37  ;;  %v481_v39 = vpop.f32.mrb[5].mxu0 }
 0x2d8   :  { %v365_v40 = vpop.f32.mrb[6].mxu0 }
 0x2d9   :  { %368 = vmax.xlane.f32.xlu0 %v363_v38  ;;  %v482_v41 = vpop.f32.mrb[7].mxu0 }
 0x366   :  { %v369_v42 = vpop.xlane.xlu0 %368 }
 0x367   :  { %v370_v43 = vsub.f32 %v363_v38, %v369_v42 }
 0x369   :  { %v371_v44 = vmul.f32 1.442695, %v370_v43 }
 0x36b   :  { %509 = vpow2.f32 %v371_v44 }
 0x375   :  { %v510_v45 = vpop.eup %509 }
 0x376   :  { %373 = vadd.xlane.f32.xlu0 %v510_v45 }
 0x403   :  { %v374_v46 = vpop.xlane.xlu0 %373 }
 0x404   :  { %511 = vrcp.f32 %v374_v46 }
 0x40e   :  { %v512_v47 = vpop.eup %511 }
 0x40f   :  { %v376_v48 = vmul.f32 %v512_v47, %v510_v45 }
 0x411   :  { %378 = vst.msk [vmem:[#allocation10] sm:$0xff] %vm377_vm2, %v376_v48 }
 0x412   :  { %612 = shalt.err (!%p609_p8)
}
 0x413   :  { %s613_s8 = scalar_lea.hbm %s785_s7, 128 }
 0x414   :  { %p614_p9 = scmp.ne.s32.totalorder %s785_s7, %s613_s8  ;;  %p617_p10 = scmp.lt.u32.totalorder %s613_s8, %s785_s7 }
 0x416   :  { %p619_p11 = pnand %p617_p10, %p614_p9 }
 0x418   :  { %622 = shalt.err (!%p619_p11)
}
 0x419   :  { %388 = dma.vmem_to_hbm [thread:$0]  %s386_s28, 128, %s785_s7, [#allocation4]  }
 0x41a   :  { %629 = dma.done.wait [#allocation4], 128  }
 0x41b   :  { %630 = vsyncadd [#allocation4], 4294967168 }
 0x41c   :  { %392 = vsyncpa [#allocation3], 1 }
 0x41d   :  { %393 = vsyncpa [#allocation6], 1 }
 0x41e   :  { %394 = vsyncpa [#allocation9], 1 }
 0x41f   :  { %395 = vsyncpa [#allocation4], 1 }

</bundles_post_ra>
